<compile_context>
chip_gen: v5e
topology: v5e:2x2
jax: 0.10.0
libtpu: 0.0.40
codegen_flags: <defaults>
</compile_context>

<pallas_src>
import functools
import math

import jax
import jax.numpy as jnp
from jax.experimental import pallas as pl
from jax.experimental.pallas import tpu as pltpu

LANE = 128


def _round_up(x, m):
    return ((x + m - 1) // m) * m


def _slab_layout(E, VT):
    """Row offset of every weight/bias block inside the single packed slab.
    Every block starts at a multiple of 8 rows (sublane-tile aligned) so the
    in-kernel static slices never straddle a (8,128) tile boundary."""
    offs = {}
    r = 0
    for name, rows in (('emb', VT), ('wq', E), ('wk', E), ('wv', E), ('wo', E),
                       ('w1', E), ('w2', 2 * E), ('wout', E),
                       ('bq', 1), ('bk', 1), ('bv', 1), ('bo', 1),
                       ('b1', 1), ('b2', 1), ('bout', 1)):
        offs[name] = r
        r += _round_up(rows, 8)
    return offs, r


def transformer_kernel(tok_ref, w_ref, logits_ref, *, B, S, E, VT, offs):
    BS = B * S
    Vpad = logits_ref.shape[1]
    f32 = jnp.float32

    def blk(name, rows, cols):
        r = offs[name]
        return w_ref[r:r + rows, 0:cols]   # static, tile-aligned slice load

    # --- embedding lookup: one-hot compare (VPU) + one 2-D matmul (MXU) ---
    # TODO(synk): out-of-range token ids map to a zero embedding row instead of
    # raising like nn.Embedding would (fine for valid inputs).
    tok = tok_ref[...]                                              # [BS, 1] int32
    iota = jax.lax.broadcasted_iota(jnp.int32, (BS, VT), 1)
    onehot = (iota == tok).astype(f32)                              # [BS, VT]
    x = jnp.dot(onehot, blk('emb', VT, E),
                preferred_element_type=f32)                         # [BS, E]

    # --- K / V over the whole sequence: two plain 2-D matmuls ---
    k = (jnp.dot(x, blk('wk', E, E), preferred_element_type=f32)
         + blk('bk', 1, E)).reshape(B, S, E)                        # [B, S, E]
    v = (jnp.dot(x, blk('wv', E, E), preferred_element_type=f32)
         + blk('bv', 1, E)).reshape(B, S, E)                        # [B, S, E]

    # --- query for the LAST token only (1/sqrt(E) pre-folded into wq/bq) ---
    x_last = x.reshape(B, S, E)[:, S - 1, :]                        # [B, E]
    q = (jnp.dot(x_last, blk('wq', E, E), preferred_element_type=f32)
         + blk('bq', 1, E))                                         # [B, E]

    # --- single-head attention for the last query row, on VPU/XLU only ---
    scores = jnp.sum(q[:, None, :] * k, axis=-1)                    # [B, S]
    scores = scores - jnp.max(scores, axis=-1, keepdims=True)
    p = jnp.exp(scores)
    p = p / jnp.sum(p, axis=-1, keepdims=True)                      # exact softmax
    attn = jnp.sum(p[:, :, None] * v, axis=1)                       # [B, E]

    attn_out = (jnp.dot(attn, blk('wo', E, E), preferred_element_type=f32)
                + blk('bo', 1, E))                                  # [B, E]

    # --- feed-forward MLP on the last token ---
    h = (jnp.dot(attn_out, blk('w1', E, 2 * E), preferred_element_type=f32)
         + blk('b1', 1, 2 * E))
    h = jnp.maximum(h, 0.0)                                         # ReLU
    ff = (jnp.dot(h, blk('w2', 2 * E, E), preferred_element_type=f32)
          + blk('b2', 1, E))                                        # [B, E]

    # --- vocabulary projection (lane-dense, padded to 128 wide) ---
    logits = (jnp.dot(ff, blk('wout', E, Vpad), preferred_element_type=f32)
              + blk('bout', 1, Vpad))                               # [B, Vpad]
    logits_ref[...] = logits.astype(logits_ref.dtype)


def pack_params(params):
    """One-time packing of all weights/biases into a single lane-dense VMEM slab:
    transposed to [in, out], KQ scale folded, vocab projection padded to 128."""
    E = params['wq'].shape[0]
    V = params['out_w'].shape[0]
    VT = _round_up(V, 8)                  # padded embedding-table rows
    Vpad = _round_up(V, LANE)             # lane-dense vocab width
    width = max(LANE, Vpad, 2 * E)
    scale = 1.0 / math.sqrt(float(E))
    offs, rows = _slab_layout(E, VT)

    slab = jnp.zeros((rows, width), jnp.float32)

    def put(s, name, mat):
        mat = jnp.asarray(mat, jnp.float32)
        r = offs[name]
        return s.at[r:r + mat.shape[0], 0:mat.shape[1]].set(mat)

    slab = put(slab, 'emb', params['embedding'])               # [V, E]
    slab = put(slab, 'wq', params['wq'].T * scale)             # [E, E]
    slab = put(slab, 'wk', params['wk'].T)
    slab = put(slab, 'wv', params['wv'].T)
    slab = put(slab, 'wo', params['wo'].T)
    slab = put(slab, 'w1', params['w1'].T)                     # [E, 2E]
    slab = put(slab, 'w2', params['w2'].T)                     # [2E, E]
    slab = put(slab, 'wout', params['out_w'].T)                # [E, V] (cols V..Vpad = 0)
    slab = put(slab, 'bq', (params['bq'] * scale).reshape(1, E))
    slab = put(slab, 'bk', params['bk'].reshape(1, E))
    slab = put(slab, 'bv', params['bv'].reshape(1, E))
    slab = put(slab, 'bo', params['bo'].reshape(1, E))
    slab = put(slab, 'b1', params['b1'].reshape(1, 2 * E))
    slab = put(slab, 'b2', params['b2'].reshape(1, E))
    slab = put(slab, 'bout', params['out_b'].reshape(1, V))

    return {'slab': slab, 'E': E, 'V': V, 'VT': VT, 'Vpad': Vpad, 'offs': offs}


def base_transformer_forward(tokens, packed):
    """tokens: int32 [B, S] -> logits f32 [B, vocab_size]."""
    B, S = tokens.shape
    E, V, VT, Vpad = packed['E'], packed['V'], packed['VT'], packed['Vpad']
    slab = packed['slab']
    offs = packed['offs']
    tok = tokens.reshape(B * S, 1).astype(jnp.int32)

    kernel = functools.partial(transformer_kernel,
                               B=B, S=S, E=E, VT=VT, offs=offs)

    BS = B * S
    flops = 2 * (BS * VT * E + 2 * BS * E * E + B * E * E
                 + 2 * B * S * E + B * E * E + 2 * B * E * (2 * E)
                 + B * E * Vpad)
    bytes_accessed = slab.size * 4 + tok.size * 4 + B * Vpad * 4

    vmem = pl.BlockSpec(memory_space=pltpu.MemorySpace.VMEM)
    logits_padded = pl.pallas_call(
        kernel,
        out_shape=jax.ShapeDtypeStruct((B, Vpad), jnp.float32),
        in_specs=[vmem, vmem],
        out_specs=vmem,
        cost_estimate=pl.CostEstimate(flops=flops, transcendentals=B * S,
                                      bytes_accessed=bytes_accessed),
    )(tok, slab)
    # Module semantics are [batch, vocab_size]; the padded tail [V:Vpad] is all
    # zeros, so the consumer could equally keep the padded slab and mask there.
    return logits_padded[:, :V]


def reference_forward(tokens, params):
    """Pure-JAX reference of the PyTorch module's forward."""
    E = params['wq'].shape[0]
    scale = 1.0 / math.sqrt(float(E))
    x = params['embedding'][tokens]                               # [B, S, E]
    q = x @ params['wq'].T + params['bq']
    k = x @ params['wk'].T + params['bk']
    v = x @ params['wv'].T + params['bv']
    s = jnp.einsum('bqe,bke->bqk', q * scale, k)
    s = s - jnp.max(s, axis=-1, keepdims=True)
    p = jnp.exp(s)
    p = p / jnp.sum(p, axis=-1, keepdims=True)
    attn = jnp.einsum('bqk,bke->bqe', p, v)
    attn_out = attn @ params['wo'].T + params['bo']
    last = attn_out[:, -1, :]
    h = jnp.maximum(last @ params['w1'].T + params['b1'], 0.0)
    ff = h @ params['w2'].T + params['b2']
    return ff @ params['out_w'].T + params['out_b']


def init_params(key, max_int=10, embed_dim=32):
    """Deterministic synthetic parameters matching the module's shapes."""
    vocab_size = 2 * max_int + 3
    E, V = embed_dim, vocab_size
    ks = jax.random.split(key, 10)
    s = 0.05
    return {
        'embedding': s * jax.random.normal(ks[0], (V, E), jnp.float32),
        # nn.MultiheadAttention in_proj (split into q/k/v) + out_proj
        'wq': s * jax.random.normal(ks[1], (E, E), jnp.float32),
        'wk': s * jax.random.normal(ks[2], (E, E), jnp.float32),
        'wv': s * jax.random.normal(ks[3], (E, E), jnp.float32),
        'bq': jnp.zeros((E,), jnp.float32),
        'bk': jnp.zeros((E,), jnp.float32),
        'bv': jnp.zeros((E,), jnp.float32),
        'wo': s * jax.random.normal(ks[4], (E, E), jnp.float32),
        'bo': jnp.zeros((E,), jnp.float32),
        # ff: Linear(E, 2E) -> ReLU -> Linear(2E, E)
        'w1': s * jax.random.normal(ks[5], (2 * E, E), jnp.float32),
        'b1': 0.01 * jnp.ones((2 * E,), jnp.float32),
        'w2': s * jax.random.normal(ks[6], (E, 2 * E), jnp.float32),
        'b2': 0.01 * jnp.ones((E,), jnp.float32),
        # output: Linear(E, vocab_size)
        'out_w': s * jax.random.normal(ks[7], (V, E), jnp.float32),
        'out_b': jnp.zeros((V,), jnp.float32),
    }


if __name__ == "__main__":
    key = jax.random.PRNGKey(0)
    pkey, tkey = jax.random.split(key)

    max_int = 10          # vocab_size = 2*10 + 3 = 23
    embed_dim = 32
    batch, seq = 2, 8

    params = init_params(pkey, max_int=max_int, embed_dim=embed_dim)
    packed = pack_params(params)   # one-time weight packing into a single slab
    vocab_size = 2 * max_int + 3
    tokens = jax.random.randint(tkey, (batch, seq), 0, vocab_size, dtype=jnp.int32)

    logits = base_transformer_forward(tokens, packed)
    logits = jax.block_until_ready(logits)
    assert logits.shape == (batch, vocab_size)
    assert bool(jnp.all(jnp.isfinite(logits)))

    # sanity check against a pure-JAX reference (tolerance covers MXU rounding)
    ref = reference_forward(tokens, params)
    assert bool(jnp.allclose(logits, ref, rtol=2e-2, atol=1e-3))

    print("KERNEL_OK")
</pallas_src>

<mosaic_0001>
module attributes {stable_mosaic.version = 11 : i64} {
  func.func @transformer_kernel(%arg0: memref<16x1xi32, #tpu.memory_space<vmem>>, %arg1: memref<336x128xf32, #tpu.memory_space<vmem>>, %arg2: memref<2x128xf32, #tpu.memory_space<vmem>>) attributes {dimension_semantics = [], scalar_prefetch = 0 : i64, scratch_operands = 0 : i64, tpu.core_type = #tpu.core_type<tc>} {
    %c0 = arith.constant 0 : index
    %c0_0 = arith.constant 0 : index
    %0 = vector.load %arg0[%c0, %c0_0] : memref<16x1xi32, #tpu.memory_space<vmem>>, vector<16x1xi32>
    %1 = tpu.iota {dimensions = array<i32: 1>} : vector<16x24xi32>
    %2 = vector.broadcast %0 : vector<16x1xi32> to vector<16x24xi32>
    %3 = arith.cmpi eq, %1, %2 : vector<16x24xi32>
    %4 = arith.extui %3 : vector<16x24xi1> to vector<16x24xi32>
    %5 = arith.sitofp %4 : vector<16x24xi32> to vector<16x24xf32>
    %c0_1 = arith.constant 0 : index
    %c0_2 = arith.constant 0 : index
    %6 = vector.load %arg1[%c0_1, %c0_2] : memref<336x128xf32, #tpu.memory_space<vmem>>, vector<24x32xf32>
    %cst = arith.constant dense<0.000000e+00> : vector<16x32xf32>
    %7 = tpu.matmul %5, %6, %cst {dimension_numbers = #tpu.dot_dimension_numbers<[1], [0], [0], [1], [0, 0, 1, 1], [], []>} : vector<16x24xf32>, vector<24x32xf32>, vector<16x32xf32> -> vector<16x32xf32>
    %c56 = arith.constant 56 : index
    %c0_3 = arith.constant 0 : index
    %8 = vector.load %arg1[%c56, %c0_3] : memref<336x128xf32, #tpu.memory_space<vmem>>, vector<32x32xf32>
    %cst_4 = arith.constant dense<0.000000e+00> : vector<16x32xf32>
    %9 = tpu.matmul %7, %8, %cst_4 {dimension_numbers = #tpu.dot_dimension_numbers<[1], [0], [0], [1], [0, 0, 1, 1], [], []>} : vector<16x32xf32>, vector<32x32xf32>, vector<16x32xf32> -> vector<16x32xf32>
    %c288 = arith.constant 288 : index
    %c0_5 = arith.constant 0 : index
    %10 = vector.load %arg1[%c288, %c0_5] : memref<336x128xf32, #tpu.memory_space<vmem>>, vector<1x32xf32>
    %11 = vector.broadcast %10 : vector<1x32xf32> to vector<16x32xf32>
    %12 = arith.addf %9, %11 : vector<16x32xf32>
    %13 = vector.shape_cast %12 : vector<16x32xf32> to vector<2x8x32xf32>
    %c88 = arith.constant 88 : index
    %c0_6 = arith.constant 0 : index
    %14 = vector.load %arg1[%c88, %c0_6] : memref<336x128xf32, #tpu.memory_space<vmem>>, vector<32x32xf32>
    %cst_7 = arith.constant dense<0.000000e+00> : vector<16x32xf32>
    %15 = tpu.matmul %7, %14, %cst_7 {dimension_numbers = #tpu.dot_dimension_numbers<[1], [0], [0], [1], [0, 0, 1, 1], [], []>} : vector<16x32xf32>, vector<32x32xf32>, vector<16x32xf32> -> vector<16x32xf32>
    %c296 = arith.constant 296 : index
    %c0_8 = arith.constant 0 : index
    %16 = vector.load %arg1[%c296, %c0_8] : memref<336x128xf32, #tpu.memory_space<vmem>>, vector<1x32xf32>
    %17 = vector.broadcast %16 : vector<1x32xf32> to vector<16x32xf32>
    %18 = arith.addf %15, %17 : vector<16x32xf32>
    %19 = vector.shape_cast %18 : vector<16x32xf32> to vector<2x8x32xf32>
    %20 = vector.shape_cast %7 : vector<16x32xf32> to vector<2x8x32xf32>
    %21 = vector.extract_strided_slice %20 {offsets = [0, 7, 0], sizes = [2, 1, 32], strides = [1, 1, 1]} : vector<2x8x32xf32> to vector<2x1x32xf32>
    %22 = vector.shape_cast %21 : vector<2x1x32xf32> to vector<2x32xf32>
    %c24 = arith.constant 24 : index
    %c0_9 = arith.constant 0 : index
    %23 = vector.load %arg1[%c24, %c0_9] : memref<336x128xf32, #tpu.memory_space<vmem>>, vector<32x32xf32>
    %cst_10 = arith.constant dense<0.000000e+00> : vector<2x32xf32>
    %24 = tpu.matmul %22, %23, %cst_10 {dimension_numbers = #tpu.dot_dimension_numbers<[1], [0], [0], [1], [0, 0, 1, 1], [], []>} : vector<2x32xf32>, vector<32x32xf32>, vector<2x32xf32> -> vector<2x32xf32>
    %c280 = arith.constant 280 : index
    %c0_11 = arith.constant 0 : index
    %25 = vector.load %arg1[%c280, %c0_11] : memref<336x128xf32, #tpu.memory_space<vmem>>, vector<1x32xf32>
    %26 = vector.broadcast %25 : vector<1x32xf32> to vector<2x32xf32>
    %27 = arith.addf %24, %26 : vector<2x32xf32>
    %28 = vector.shape_cast %27 : vector<2x32xf32> to vector<2x1x32xf32>
    %29 = vector.broadcast %28 : vector<2x1x32xf32> to vector<2x8x32xf32>
    %30 = arith.mulf %29, %13 : vector<2x8x32xf32>
    %cst_12 = arith.constant dense<0.000000e+00> : vector<2x8xf32>
    %31 = vector.multi_reduction <add>, %30, %cst_12 [2] : vector<2x8x32xf32> to vector<2x8xf32>
    %cst_13 = arith.constant dense<0xFF800000> : vector<2xf32>
    %32 = vector.multi_reduction <maximumf>, %31, %cst_13 [1] : vector<2x8xf32> to vector<2xf32>
    %33 = vector.shape_cast %32 : vector<2xf32> to vector<2x1xf32>
    %34 = vector.broadcast %33 : vector<2x1xf32> to vector<2x8xf32>
    %35 = arith.subf %31, %34 : vector<2x8xf32>
    %36 = math.exp %35 : vector<2x8xf32>
    %cst_14 = arith.constant dense<0.000000e+00> : vector<2xf32>
    %37 = vector.multi_reduction <add>, %36, %cst_14 [1] : vector<2x8xf32> to vector<2xf32>
    %38 = vector.shape_cast %37 : vector<2xf32> to vector<2x1xf32>
    %39 = vector.broadcast %38 : vector<2x1xf32> to vector<2x8xf32>
    %40 = arith.divf %36, %39 : vector<2x8xf32>
    %41 = vector.shape_cast %40 : vector<2x8xf32> to vector<2x8x1xf32>
    %42 = vector.broadcast %41 : vector<2x8x1xf32> to vector<2x8x32xf32>
    %43 = arith.mulf %42, %19 : vector<2x8x32xf32>
    %cst_15 = arith.constant dense<0.000000e+00> : vector<2x32xf32>
    %44 = vector.multi_reduction <add>, %43, %cst_15 [1] : vector<2x8x32xf32> to vector<2x32xf32>
    %c120 = arith.constant 120 : index
    %c0_16 = arith.constant 0 : index
    %45 = vector.load %arg1[%c120, %c0_16] : memref<336x128xf32, #tpu.memory_space<vmem>>, vector<32x32xf32>
    %cst_17 = arith.constant dense<0.000000e+00> : vector<2x32xf32>
    %46 = tpu.matmul %44, %45, %cst_17 {dimension_numbers = #tpu.dot_dimension_numbers<[1], [0], [0], [1], [0, 0, 1, 1], [], []>} : vector<2x32xf32>, vector<32x32xf32>, vector<2x32xf32> -> vector<2x32xf32>
    %c304 = arith.constant 304 : index
    %c0_18 = arith.constant 0 : index
    %47 = vector.load %arg1[%c304, %c0_18] : memref<336x128xf32, #tpu.memory_space<vmem>>, vector<1x32xf32>
    %48 = vector.broadcast %47 : vector<1x32xf32> to vector<2x32xf32>
    %49 = arith.addf %46, %48 : vector<2x32xf32>
    %c152 = arith.constant 152 : index
    %c0_19 = arith.constant 0 : index
    %50 = vector.load %arg1[%c152, %c0_19] : memref<336x128xf32, #tpu.memory_space<vmem>>, vector<32x64xf32>
    %cst_20 = arith.constant dense<0.000000e+00> : vector<2x64xf32>
    %51 = tpu.matmul %49, %50, %cst_20 {dimension_numbers = #tpu.dot_dimension_numbers<[1], [0], [0], [1], [0, 0, 1, 1], [], []>} : vector<2x32xf32>, vector<32x64xf32>, vector<2x64xf32> -> vector<2x64xf32>
    %c312 = arith.constant 312 : index
    %c0_21 = arith.constant 0 : index
    %52 = vector.load %arg1[%c312, %c0_21] : memref<336x128xf32, #tpu.memory_space<vmem>>, vector<1x64xf32>
    %53 = vector.broadcast %52 : vector<1x64xf32> to vector<2x64xf32>
    %54 = arith.addf %51, %53 : vector<2x64xf32>
    %cst_22 = arith.constant 0.000000e+00 : f32
    %55 = vector.broadcast %cst_22 : f32 to vector<2x64xf32>
    %56 = arith.maximumf %54, %55 : vector<2x64xf32>
    %c184 = arith.constant 184 : index
    %c0_23 = arith.constant 0 : index
    %57 = vector.load %arg1[%c184, %c0_23] : memref<336x128xf32, #tpu.memory_space<vmem>>, vector<64x32xf32>
    %cst_24 = arith.constant dense<0.000000e+00> : vector<2x32xf32>
    %58 = tpu.matmul %56, %57, %cst_24 {dimension_numbers = #tpu.dot_dimension_numbers<[1], [0], [0], [1], [0, 0, 1, 1], [], []>} : vector<2x64xf32>, vector<64x32xf32>, vector<2x32xf32> -> vector<2x32xf32>
    %c320 = arith.constant 320 : index
    %c0_25 = arith.constant 0 : index
    %59 = vector.load %arg1[%c320, %c0_25] : memref<336x128xf32, #tpu.memory_space<vmem>>, vector<1x32xf32>
    %60 = vector.broadcast %59 : vector<1x32xf32> to vector<2x32xf32>
    %61 = arith.addf %58, %60 : vector<2x32xf32>
    %c248 = arith.constant 248 : index
    %c0_26 = arith.constant 0 : index
    %62 = vector.load %arg1[%c248, %c0_26] : memref<336x128xf32, #tpu.memory_space<vmem>>, vector<32x128xf32>
    %cst_27 = arith.constant dense<0.000000e+00> : vector<2x128xf32>
    %63 = tpu.matmul %61, %62, %cst_27 {dimension_numbers = #tpu.dot_dimension_numbers<[1], [0], [0], [1], [0, 0, 1, 1], [], []>} : vector<2x32xf32>, vector<32x128xf32>, vector<2x128xf32> -> vector<2x128xf32>
    %c328 = arith.constant 328 : index
    %c0_28 = arith.constant 0 : index
    %64 = vector.load %arg1[%c328, %c0_28] : memref<336x128xf32, #tpu.memory_space<vmem>>, vector<1x128xf32>
    %65 = vector.broadcast %64 : vector<1x128xf32> to vector<2x128xf32>
    %66 = arith.addf %63, %65 : vector<2x128xf32>
    %c0_29 = arith.constant 0 : index
    %c0_30 = arith.constant 0 : index
    %67 = vector.load %arg2[%c0_29, %c0_30] : memref<2x128xf32, #tpu.memory_space<vmem>>, vector<2x128xf32>
    tpu.vector_store %arg2[%c0_29, %c0_30], %66 {strides = array<i32>} : memref<2x128xf32, #tpu.memory_space<vmem>>, vector<2x128xf32>,
    return
  }
}

</mosaic_0001>

<bundles_post_ra>
// kernel: tpu_custom_call.1
= control target key start
LH: loop header
LB: loop body
LE: loop exit
PB: predicated region body
PF: predicated region fallthrough
CT: control target
= control target key end

     0   :  { %7 = vsyncpa [#allocation3], 0  ;;  %s575_s0 = inlined_call_operand.vmem [shape: s32[16,1], index: 0, kind: input, shape index: {}]   ;;  %s576_s1 = inlined_call_operand.hbm [shape: f32[336,128], index: 1, kind: input, shape index: {}]   ;;  %s577_s2 = inlined_call_operand.hbm [shape: f32[2,128], index: 2, kind: output, shape index: {}]  }
   0x1   :  { %8 = vsyncpa [#allocation4], 0  ;;  %s15_s11 = sshll.u32 %s576_s1, 4  ;;  %s516_s12 = smov [#allocation2]   ;;  %s16_s11 = int_to_ptr.hbm [resolvable:$true] %s15_s11 }
   0x2   :  { %s17_s13 = sshll.u32 %s516_s12, 4  ;;  %s517_s14 = smov 128   ;;  %s18_s13 = int_to_ptr.vmem [resolvable:$true] %s17_s13 }
   0x3   :  { %s518_s15 = smov 8  }
   0x4   :  { %23 = dma.hbm_to_vmem [thread:$0]  %s16_s11, 5376, %s18_s13, [#allocation3], %s517_s14, %s517_s14, %s518_s15  }
   0x5   :  { %512 = dma.done.wait [#allocation3], 5376  }
   0x6   :  { %513 = vsyncadd [#allocation3], 4294961920  ;;  %v519_v0 = vmov 0   ;;  %v28_v1 = vld [vmem:[%s575_s0] sm:$0xff]  ;;  %v46_v2 = vld [vmem:[#allocation2 + $0x10] sm:$0xff]  ;;  %v30_v12 = vlaneseq  ;;  %vm47_vm0 = vcmask 195584  }
   0x7   :  { %446 = vset.pattern.permute.xlu0 %v519_v0  ;;  %447 = vset.pattern.permute.xlu2 %v519_v0  ;;  %v45_v3 = vld [vmem:[#allocation2 + $0x8] sm:$0xff]  ;;  %v44_v5 = vld [vmem:[#allocation2] sm:$0xff]  ;;  %v80_v6 = vld [vmem:[#allocation2 + $0x50] sm:$0xff]  ;;  %v520_v15 = vmov 0.0   ;;  %vm83_vm3 = vcmask 261120   ;;  %vm150_vm4 = vcmask 1041409  }
   0x8   :  { %448 = vset.pattern.permute.xlu1 %v519_v0  ;;  %33 = vperm.xlu0 %446, %v28_v1   ;;  %v29_v4 = vld [vmem:[%s575_s0 + $0x8] sm:$0xff]  ;;  %v116_v7 = vld [vmem:[#allocation2 + $0x70] sm:$0xff]  ;;  %v78_v10 = vld [vmem:[#allocation2 + $0x40] sm:$0xff]  ;;  %v546_v13 = vand.u32 127, %v30_v12  ;;  %vm194_vm5 = vcmask 58368   ;;  %vm356_vm14 = vcmask 523264  }
   0x9   :  { %67 = vmatpush.msra.mxu0 %v46_v2  ;;  %v79_v8 = vld [vmem:[#allocation2 + $0x48] sm:$0xff]  ;;  %102 = vmatpush.msra.mxu1 %v80_v6  ;;  %v114_v11 = vld [vmem:[#allocation2 + $0x60] sm:$0xff]  ;;  %v77_v19 = vld [vmem:[#allocation2 + $0x38] sm:$0xff]  ;;  %s521_s0 = smov [#allocation5]   ;;  %s417_s22 = sshll.u32 %s577_s2, 4  ;;  %s418_s22 = int_to_ptr.hbm [resolvable:$true] %s417_s22 }
   0xa   :  { %131 = vmatpush.msra.mxu2 %v116_v7  ;;  %v115_v9 = vld [vmem:[#allocation2 + $0x68] sm:$0xff]  ;;  %v113_v20 = vld [vmem:[#allocation2 + $0x58] sm:$0xff]  ;;  %v145_v21 = vld [vmem:[#allocation2 + $0x30] sm:$0xff]  ;;  %s415_s19 = sshll.u32 %s521_s0, 4  ;;  %s416_s19 = int_to_ptr.vmem [resolvable:$true] %s415_s19 }
   0xb   :  { %68 = vmatpush.msra.mxu0 %v45_v3  ;;  %103 = vmatpush.msra.mxu1 %v79_v8  ;;  %v144_v22 = vld [vmem:[#allocation2 + $0x28] sm:$0xff]  ;;  %v143_v23 = vld [vmem:[#allocation2 + $0x20] sm:$0xff]  ;;  %v142_v24 = vld [vmem:[#allocation2 + $0x18] sm:$0xff] }
   0xc   :  { %132 = vmatpush.msra.mxu2 %v115_v9  ;;  %166 = vmatpush.msra.mxu3 %v145_v21  ;;  %v451_v31 = vld [vmem:[#allocation2 + $0x118] ss:$0 sm:$0xff]  ;;  %v449_v32 = vld [vmem:[#allocation2 + $0x120] ss:$0 sm:$0xff] }
   0xd   :  { %69 = vmatpush.msra.mxu0 %v44_v5  ;;  %104 = vmatpush.msra.mxu1 %v78_v10 }
   0xe   :  { %133 = vmatpush.msra.mxu2 %v114_v11  ;;  %167 = vmatpush.msra.mxu3 %v144_v22 }
   0xf   :  { %105 = vmatpush.msra.mxu1 %v77_v19 }
  0x10   :  { %36 = vperm.xlu0 %446, %v29_v4   ;;  %134 = vmatpush.msra.mxu2 %v113_v20 }
  0x11   :  { %168 = vmatpush.msra.mxu3 %v143_v23 }
  0x13   :  { %169 = vmatpush.msra.mxu3 %v142_v24 }
  0x7a   :  { %v34_v14 = vpop.permute.xlu0 %33 }
  0x7b   :  { %vm38_vm1 = vcmp.eq.s32.totalorder %v546_v13, %v34_v14 }
  0x7c   :  { %v427_v16 = vsel %vm38_vm1, 1.0, %v520_v15 }
  0x7d   :  { %429 = vmatmul.msk.f32.vlgmr.msra.gmra.mxu0 %vm47_vm0, %v427_v16 }
  0x82   :  { %v37_v17 = vpop.permute.xlu0 %36 }
  0x83   :  { %vm39_vm2 = vcmp.eq.s32.totalorder %v546_v13, %v37_v17 }
  0x84   :  { %v428_v18 = vsel %vm39_vm2, 1.0, %v520_v15 }
  0x85   :  { %430 = vmatmul.msk.f32.gmra.mxu0 %vm47_vm0, %v428_v18 }
  0xfa   :  { %v71_v25 = vpop.f32.mrf.mxu0 }
  0xfb   :  { %431 = vmatmul.msk.f32.vlgmr.msra.gmra.mxu1 %vm83_vm3, %v71_v25  ;;  %433 = vmatmul.msk.f32.vlgmr.msra.gmra.mxu2 %vm83_vm3, %v71_v25  ;;  %v148_v27 = vrot.slane %v71_v25, 7 }
 0x102   :  { %v74_v26 = vpop.f32.mrf.mxu0 }
 0x103   :  { %v149_v28 = vrot.slane %v74_v26, 6  ;;  %432 = vmatmul.msk.f32.gmra.mxu1 %vm83_vm3, %v74_v26  ;;  %434 = vmatmul.msk.f32.gmra.mxu2 %vm83_vm3, %v74_v26 }
 0x105   :  { %v151_v29 = vsel %vm150_vm4, %v149_v28, %v148_v27  ;;  %v288_v27 = vld [vmem:[#allocation2 + $0x90] sm:$0xff]  ;;  %v287_v28 = vld [vmem:[#allocation2 + $0x88] sm:$0xff] }
 0x106   :  { %435 = vmatmul.msk.f32.vlgmr.msra.gmra.mxu3 %vm83_vm3, %v151_v29  ;;  %v286_v29 = vld [vmem:[#allocation2 + $0x80] sm:$0xff] }
 0x107   :  { %308 = vmatpush.msrb.mxu3 %v288_v27 }
 0x109   :  { %309 = vmatpush.msrb.mxu3 %v287_v28 }
 0x10b   :  { %310 = vmatpush.msrb.mxu3 %v286_v29 }
 0x178   :  { %v107_v30 = vpop.f32.mrf.mxu1 }
 0x179   :  { %v108_v35 = vadd.f32 %v449_v32, %v107_v30  ;;  %v285_v30 = vld [vmem:[#allocation2 + $0x78] sm:$0xff] }
 0x17a   :  { %311 = vmatpush.msrb.mxu3 %v285_v30 }
 0x180   :  { %v110_v39 = vpop.f32.mrf.mxu1 }
 0x181   :  { %v111_v42 = vadd.f32 %v449_v32, %v110_v39  ;;  %v318_v32 = vld [vmem:[#allocation2 + $0xa8] sm:$0xff] }
 0x189   :  { %v171_v33 = vpop.f32.mrf.mxu3 }
 0x18a   :  { %v172_v34 = vadd.f32 %v451_v31, %v171_v33  ;;  %v319_v31 = vld [vmem:[#allocation2 + $0xb0] sm:$0xff]  ;;  %v136_v33 = vpop.f32.mrf.mxu2 }
 0x18b   :  { %337 = vmatpush.msrb.mxu0 %v319_v31 }
 0x18c   :  { %v175_v36 = vrot.slane %v172_v34, 1  ;;  %v176_v37 = vperm.slane %v172_v34, 0  ;;  %v317_v34 = vld [vmem:[#allocation2 + $0xa0] sm:$0xff] }
 0x18d   :  { %338 = vmatpush.msrb.mxu0 %v318_v32 }
 0x18e   :  { %v180_v38 = vmul.f32 %v176_v37, %v108_v35  ;;  %v177_v40 = vperm.slane %v175_v36, 0  ;;  %v316_v35 = vld [vmem:[#allocation2 + $0x98] sm:$0xff]  ;;  %v450_v36 = vld [vmem:[#allocation2 + $0x128] ss:$0 sm:$0xff] }
 0x18f   :  { %339 = vmatpush.msrb.mxu0 %v317_v34 }
 0x190   :  { %v182_v41 = vsel %vm83_vm3, %v180_v38, 0.0  ;;  %v181_v43 = vmul.f32 %v177_v40, %v111_v42  ;;  %v137_v38 = vadd.f32 %v450_v36, %v136_v33 }
 0x191   :  { %183 = vadd.xlane.f32.xlu1 %v182_v41  ;;  %340 = vmatpush.msrb.mxu0 %v316_v35 }
 0x192   :  { %v185_v44 = vsel %vm83_vm3, %v181_v43, 0.0  ;;  %v139_v37 = vpop.f32.mrf.mxu2 }
 0x193   :  { %v140_v39 = vadd.f32 %v450_v36, %v139_v37 }
 0x199   :  { %186 = vadd.xlane.f32.xlu1 %v185_v44 }
 0x204   :  { %v184_v45 = vpop.xlane.xlu1 %183 }
 0x205   :  { %v190_v47 = vperm.slane %v184_v45, %v546_v13 }
 0x20c   :  { %v187_v46 = vpop.xlane.xlu1 %186 }
 0x20d   :  { %v191_v48 = vperm.slane %v187_v46, %v546_v13 }
 0x20f   :  { %v192_v49 = vsel %vm150_vm4, %v191_v48, %v190_v47 }
 0x210   :  { %v195_v50 = vsel %vm194_vm5, %v192_v49, -inf }
 0x211   :  { %196 = vmax.xlane.f32.xlu2 %v195_v50 }
 0x284   :  { %v197_v51 = vpop.xlane.xlu2 %196 }
 0x285   :  { %v199_v52 = vperm.slane %v197_v51, 0  ;;  %v200_v53 = vperm.slane %v197_v51, 1 }
 0x287   :  { %v203_v54 = vsub.f32 %v184_v45, %v199_v52  ;;  %v204_v55 = vsub.f32 %v187_v46, %v200_v53 }
 0x289   :  { %v205_v56 = vmul.f32 1.442695, %v203_v54  ;;  %v207_v57 = vmul.f32 1.442695, %v204_v55 }
 0x28b   :  { %456 = vpow2.f32 %v205_v56 }
 0x28c   :  { %458 = vpow2.f32 %v207_v57 }
 0x291   :  { %v457_v58 = vpop.eup %456 }
 0x292   :  { %v459_v59 = vpop.eup %458  ;;  %212 = vperm.xlu2 %447, %v457_v58  }
 0x293   :  { %215 = vperm.xlu0 %446, %v459_v59  }
 0x2ec   :  { %v213_v60 = vpop.permute.xlu2 %212 }
 0x2ed   :  { %v217_v62 = vperm.slane %v213_v60, %v546_v13  ;;  %v352_v60 = vld [vmem:[#allocation2 + $0xe8] sm:$0xff] }
 0x305   :  { %v216_v61 = vpop.permute.xlu0 %215 }
 0x306   :  { %v218_v63 = vperm.slane %v216_v61, %v546_v13  ;;  %v351_v61 = vld [vmem:[#allocation2 + $0xe0] sm:$0xff] }
 0x308   :  { %v219_v0 = vsel %vm150_vm4, %v218_v63, %v217_v62  ;;  %v350_v62 = vld [vmem:[#allocation2 + $0xd8] sm:$0xff]  ;;  %v349_v63 = vld [vmem:[#allocation2 + $0xd0] sm:$0xff] }
 0x309   :  { %v221_v1 = vsel %vm194_vm5, %v219_v0, 0.0  ;;  %v348_v0 = vld [vmem:[#allocation2 + $0xc8] sm:$0xff] }
 0x30a   :  { %222 = vadd.xlane.f32.xlu1 %v221_v1  ;;  %v452_v1 = vld [vmem:[#allocation2 + $0x130] ss:$0 sm:$0xff] }
 0x37d   :  { %v223_v2 = vpop.xlane.xlu1 %222 }
 0x37e   :  { %v225_v3 = vperm.slane %v223_v2, 0  ;;  %v226_v4 = vperm.slane %v223_v2, 1 }
 0x380   :  { %460 = vrcp.f32 %v225_v3  ;;  %v240_v11 = vand.u32 2147483648, %v225_v3  ;;  %v255_v12 = vand.u32 2147483648, %v226_v4  ;;  %v238_v13 = vand.u32 2147483647, %v225_v3 }
 0x381   :  { %462 = vrcp.f32 %v226_v4  ;;  %v253_v16 = vand.u32 2147483647, %v226_v4  ;;  %vm234_vm8 = vweird.f32 %v225_v3  ;;  %vm249_vm9 = vweird.f32 %v226_v4 }
 0x382   :  { %v241_v19 = vor.u32 1.1754944e-38, %v240_v11  ;;  %v256_v20 = vor.u32 1.1754944e-38, %v255_v12  ;;  %vm239_vm12 = vcmp.eq.f32.partialorder %v238_v13, 8.507059e+37  ;;  %v454_v13 = vld [vmem:[#allocation2 + $0x140] ss:$0 sm:$0xff] }
 0x383   :  { %vm254_vm13 = vcmp.eq.f32.partialorder %v253_v16, 8.507059e+37 }
 0x386   :  { %v461_v5 = vpop.eup %460 }
 0x387   :  { %v463_v6 = vpop.eup %462  ;;  %v230_v7 = vmul.f32 %v461_v5, %v225_v3  ;;  %vm235_vm6 = vweird.f32 %v461_v5 }
 0x388   :  { %v245_v8 = vmul.f32 %v463_v6, %v226_v4  ;;  %vm250_vm7 = vweird.f32 %v463_v6  ;;  %vm236_vm10 = vmor %vm234_vm8, %vm235_vm6  ;;  %v347_v4 = vld [vmem:[#allocation2 + $0xc0] sm:$0xff] }
 0x389   :  { %v231_v9 = vsub.f32 1.0, %v230_v7  ;;  %vm251_vm11 = vmor %vm249_vm9, %vm250_vm7  ;;  %v382_v7 = vld [vmem:[#allocation2 + $0x108] sm:$0xff] }
 0x38a   :  { %v246_v10 = vsub.f32 1.0, %v245_v8  ;;  %v381_v8 = vld [vmem:[#allocation2 + $0x100] sm:$0xff] }
 0x38b   :  { %v232_v14 = vmul.f32 %v461_v5, %v231_v9  ;;  %v380_v9 = vld [vmem:[#allocation2 + $0xf8] sm:$0xff] }
 0x38c   :  { %v247_v15 = vmul.f32 %v463_v6, %v246_v10  ;;  %v453_v10 = vld [vmem:[#allocation2 + $0x138] ss:$0 sm:$0xff] }
 0x38d   :  { %v233_v17 = vadd.f32 %v461_v5, %v232_v14 }
 0x38e   :  { %v248_v18 = vadd.f32 %v463_v6, %v247_v15 }
 0x38f   :  { %v237_v21 = vsel %vm236_vm10, %v461_v5, %v233_v17  ;;  %v346_v5 = vld [vmem:[#allocation2 + $0xb8] sm:$0xff]  ;;  %v455_v17 = vld [vmem:[#allocation2 + $0x148] ss:$0 sm:$0xff] }
 0x390   :  { %v252_v22 = vsel %vm251_vm11, %v463_v6, %v248_v18  ;;  %v242_v23 = vsel %vm239_vm12, %v241_v19, %v237_v21  ;;  %v383_v6 = vld [vmem:[#allocation2 + $0x110] sm:$0xff] }
 0x391   :  { %v257_v24 = vsel %vm254_vm13, %v256_v20, %v252_v22  ;;  %v243_v25 = vmul.f32 %v457_v58, %v242_v23  ;;  %401 = vmatpush.msrb.mxu2 %v383_v6 }
 0x392   :  { %v258_v26 = vmul.f32 %v459_v59, %v257_v24  ;;  %v353_v59 = vld [vmem:[#allocation2 + $0xf0] sm:$0xff] }
 0x393   :  { %261 = vperm.xlu0 %446, %v243_v25   ;;  %368 = vmatpush.msrb.mxu1 %v353_v59 }
 0x394   :  { %266 = vperm.xlu1 %448, %v258_v26   ;;  %402 = vmatpush.msrb.mxu2 %v382_v7 }
 0x395   :  { %369 = vmatpush.msrb.mxu1 %v352_v60 }
 0x396   :  { %403 = vmatpush.msrb.mxu2 %v381_v8 }
 0x397   :  { %370 = vmatpush.msrb.mxu1 %v351_v61 }
 0x398   :  { %404 = vmatpush.msrb.mxu2 %v380_v9 }
 0x399   :  { %371 = vmatpush.msrb.mxu1 %v350_v62 }
 0x39b   :  { %372 = vmatpush.msrb.mxu1 %v349_v63 }
 0x39d   :  { %373 = vmatpush.msrb.mxu1 %v348_v0 }
 0x39f   :  { %374 = vmatpush.msrb.mxu1 %v347_v4 }
 0x3a1   :  { %375 = vmatpush.msrb.mxu1 %v346_v5 }
 0x405   :  { %v262_v40 = vpop.permute.xlu0 %261 }
 0x406   :  { %v267_v41 = vpop.permute.xlu1 %266  ;;  %v269_v42 = vmul.f32 %v262_v40, %v137_v38 }
 0x407   :  { %v270_v43 = vmul.f32 %v267_v41, %v140_v39 }
 0x408   :  { %v271_v44 = vsel %vm83_vm3, %v269_v42, 0.0 }
 0x409   :  { %v278_v45 = vsel %vm83_vm3, %v270_v43, 0.0  ;;  %v272_v46 = vrot.slane %v271_v44, 4 }
 0x40a   :  { %v279_v47 = vrot.slane %v278_v45, 4 }
 0x40b   :  { %v273_v48 = vadd.f32 %v272_v46, %v271_v44 }
 0x40c   :  { %v280_v49 = vadd.f32 %v279_v47, %v278_v45 }
 0x40d   :  { %v274_v50 = vrot.slane %v273_v48, 2 }
 0x40e   :  { %v281_v51 = vrot.slane %v280_v49, 2 }
 0x40f   :  { %v275_v52 = vadd.f32 %v274_v50, %v273_v48 }
 0x410   :  { %v282_v53 = vadd.f32 %v281_v51, %v280_v49 }
 0x411   :  { %v276_v54 = vrot.slane %v275_v52, 1 }
 0x412   :  { %v283_v55 = vrot.slane %v282_v53, 1 }
 0x413   :  { %v277_v56 = vadd.f32 %v276_v54, %v275_v52 }
 0x414   :  { %v284_v57 = vadd.f32 %v283_v55, %v282_v53 }
 0x416   :  { %v293_v58 = vsel %vm150_vm4, %v284_v57, %v277_v56 }
 0x417   :  { %436 = vmatmul.msk.f32.vlgmr.msrb.gmra.mxu3 %vm83_vm3, %v293_v58 }
 0x49a   :  { %v313_v2 = vpop.f32.mrf.mxu3 }
 0x49b   :  { %v314_v3 = vadd.f32 %v452_v1, %v313_v2 }
 0x49d   :  { %437 = vmatmul.msk.f32.vlgmr.msrb.gmra.mxu0 %vm83_vm3, %v314_v3 }
 0x51a   :  { %v342_v11 = vpop.f32.mrf.mxu0 }
 0x51b   :  { %v343_v12 = vadd.f32 %v453_v10, %v342_v11 }
 0x51d   :  { %v345_v14 = vmax.f32 %v343_v12, 0.0 }
 0x51f   :  { %438 = vmatmul.msk.f32.vlgmr.msrb.gmra.mxu1 %vm356_vm14, %v345_v14 }
 0x59c   :  { %v377_v15 = vpop.f32.mrf.mxu1 }
 0x59d   :  { %v378_v16 = vadd.f32 %v454_v13, %v377_v15 }
 0x59f   :  { %439 = vmatmul.msk.f32.vlgmr.msrb.gmra.mxu2 %vm83_vm3, %v378_v16 }
 0x622   :  { %v406_v18 = vpop.f32.mrf.mxu2 }
 0x623   :  { %v407_v19 = vadd.f32 %v455_v17, %v406_v18 }
 0x625   :  { %409 = vst [vmem:[#allocation5] sm:$0x3] %v407_v19 }
 0x626   :  { %420 = dma.vmem_to_hbm [thread:$0]  %s416_s19, 32, %s418_s22, [#allocation4]  }
 0x627   :  { %514 = dma.done.wait [#allocation4], 32  }
 0x628   :  { %515 = vsyncadd [#allocation4], 4294967264 }
 0x629   :  { %425 = vsyncpa [#allocation3], 1 }
 0x62a   :  { %426 = vsyncpa [#allocation4], 1 }

</bundles_post_ra>
